<compile_context>
chip_gen: v7x
topology: tpu7x:2x2x1
jax: 0.10.0
libtpu: 0.0.40
codegen_flags: <defaults>
</compile_context>

<pallas_src>
import jax
import jax.numpy as jnp
from jax.experimental import pallas as pl
from jax.experimental.pallas import tpu as pltpu


def _residual_kernel(x_ref, w_ref, b_ref, o_ref):
    # x_ref: [TB, I]      VMEM
    # w_ref: [I, O]       VMEM (BN scale folded in; resident across grid steps)
    # b_ref: [1, O]       VMEM (BN shift folded in; resident)
    # o_ref: [TB, O + I]  VMEM  -> [:, :O] = relu(bn(fc(x))),  [:, O:] = x
    x = x_ref[...]
    h = jnp.dot(x, w_ref[...], preferred_element_type=jnp.float32)
    h = h + b_ref[...]
    h = jnp.maximum(h, 0.0)                      # ReLU
    o_dim = w_ref.shape[1]
    o_ref[:, :o_dim] = h.astype(o_ref.dtype)     # concat part 1: activated branch
    o_ref[:, o_dim:] = x.astype(o_ref.dtype)     # concat part 2: identity branch


def residual_forward(x, w, b, gamma, beta, running_mean, running_var,
                     eps=1e-5, block_b=256):
    """CTGAN Residual forward (eval-mode BN): cat([relu(bn(x @ w + b)), x], 1).

    x: [B, I] float32; w: [I, O]; b, gamma, beta, running_mean, running_var: [O].
    """
    B, I = x.shape
    O = w.shape[1]
    assert block_b % 8 == 0, "batch tile must be a multiple of 8 sublanes (f32)"

    # Fold inference-mode BatchNorm1d into the Linear (mathematically exact).
    f32 = jnp.float32
    s = gamma.astype(f32) * jax.lax.rsqrt(running_var.astype(f32) + eps)
    t = beta.astype(f32) - running_mean.astype(f32) * s
    w_f = (w.astype(f32) * s[None, :]).astype(x.dtype)
    b_f = (b.astype(f32) * s + t).reshape(1, O).astype(f32)

    # Fixed batch tile; pad B up to a multiple of it (rows are independent, so
    # zero-padding + slicing afterwards is exact).
    TB = max(8, min(block_b, pl.cdiv(B, 8) * 8))
    n_blocks = pl.cdiv(B, TB)
    B_pad = n_blocks * TB
    x_in = x if B_pad == B else jnp.zeros((B_pad, I), x.dtype).at[:B].set(x)

    cost = pl.CostEstimate(
        flops=2 * B_pad * I * O + 2 * B_pad * O,          # matmul + bias/relu
        transcendentals=0,
        bytes_accessed=4 * (B_pad * I + I * O + O + B_pad * (O + I)),
    )

    out = pl.pallas_call(
        _residual_kernel,
        out_shape=jax.ShapeDtypeStruct((B_pad, O + I), x.dtype),
        grid=(n_blocks,),
        in_specs=[
            pl.BlockSpec((TB, I), lambda i: (i, 0)),      # x (batch-tiled)
            pl.BlockSpec((I, O), lambda i: (0, 0)),       # fused W (resident)
            pl.BlockSpec((1, O), lambda i: (0, 0)),       # fused bias (resident)
        ],
        out_specs=pl.BlockSpec((TB, O + I), lambda i: (i, 0)),
        compiler_params=pltpu.CompilerParams(
            dimension_semantics=("parallel",),            # megacore-shard batch
        ),
        cost_estimate=cost,
    )(x_in, w_f, b_f)
    return out[:B]


if __name__ == "__main__":
    # Small shapes consistent with CTGAN's Residual blocks (128-dim features),
    # lane-aligned (I = O = 128) and with a batch that is NOT a tile multiple
    # to exercise the padded-tail path and a multi-step parallel grid.
    batch, in_dim, out_dim = 200, 128, 128
    eps = 1e-5

    key = jax.random.PRNGKey(0)
    kx, kw, kb, kg, kbe, km, kv = jax.random.split(key, 7)
    x = jax.random.normal(kx, (batch, in_dim), jnp.float32)
    lim = 1.0 / jnp.sqrt(in_dim)
    w = jax.random.uniform(kw, (in_dim, out_dim), jnp.float32, -lim, lim)
    b = jax.random.uniform(kb, (out_dim,), jnp.float32, -lim, lim)
    gamma = jax.random.uniform(kg, (out_dim,), jnp.float32, 0.5, 1.5)
    beta = 0.1 * jax.random.normal(kbe, (out_dim,), jnp.float32)
    running_mean = 0.1 * jax.random.normal(km, (out_dim,), jnp.float32)
    running_var = jax.random.uniform(kv, (out_dim,), jnp.float32, 0.5, 1.5)

    out = residual_forward(x, w, b, gamma, beta, running_mean, running_var,
                           eps=eps, block_b=128)
    out = jax.block_until_ready(out)

    # Pure-JAX reference (same math as the PyTorch forward in eval mode).
    h = x @ w + b
    h = (h - running_mean) * (gamma / jnp.sqrt(running_var + eps)) + beta
    h = jnp.maximum(h, 0.0)
    ref = jnp.concatenate([h, x], axis=1)

    assert out.shape == (batch, out_dim + in_dim)
    assert jnp.allclose(out, ref, atol=1e-4, rtol=1e-4), \
        float(jnp.max(jnp.abs(out - ref)))

    print("KERNEL_OK")
</pallas_src>

<mosaic_0001>
module attributes {stable_mosaic.version = 11 : i64} {
  func.func @_residual_kernel(%arg0: i32, %arg1: memref<128x128xf32, #tpu.memory_space<vmem>>, %arg2: memref<128x128xf32, #tpu.memory_space<vmem>>, %arg3: memref<1x128xf32, #tpu.memory_space<vmem>>, %arg4: memref<128x256xf32, #tpu.memory_space<vmem>>) attributes {dimension_semantics = [#tpu.dimension_semantics<parallel>], iteration_bounds = array<i64: 2>, scalar_prefetch = 0 : i64, scratch_operands = 0 : i64, tpu.core_type = #tpu.core_type<tc>, window_params = [{transform_indices = @transform_0, window_bounds = array<i64: 128, 128>}, {pipeline_mode = #tpu.pipeline_mode<synchronous>, transform_indices = @transform_1, window_bounds = array<i64: 128, 128>}, {pipeline_mode = #tpu.pipeline_mode<synchronous>, transform_indices = @transform_2, window_bounds = array<i64: 1, 128>}, {transform_indices = @transform_3, window_bounds = array<i64: 128, 256>}]} {
    %c0 = arith.constant 0 : index
    %c0_0 = arith.constant 0 : index
    %0 = vector.load %arg1[%c0, %c0_0] : memref<128x128xf32, #tpu.memory_space<vmem>>, vector<128x128xf32>
    %c0_1 = arith.constant 0 : index
    %c0_2 = arith.constant 0 : index
    %1 = vector.load %arg2[%c0_1, %c0_2] : memref<128x128xf32, #tpu.memory_space<vmem>>, vector<128x128xf32>
    %cst = arith.constant dense<0.000000e+00> : vector<128x128xf32>
    %2 = tpu.matmul %0, %1, %cst {dimension_numbers = #tpu.dot_dimension_numbers<[1], [0], [0], [1], [0, 0, 1, 1], [], []>} : vector<128x128xf32>, vector<128x128xf32>, vector<128x128xf32> -> vector<128x128xf32>
    %c0_3 = arith.constant 0 : index
    %c0_4 = arith.constant 0 : index
    %3 = vector.load %arg3[%c0_3, %c0_4] : memref<1x128xf32, #tpu.memory_space<vmem>>, vector<1x128xf32>
    %4 = vector.broadcast %3 : vector<1x128xf32> to vector<128x128xf32>
    %5 = arith.addf %2, %4 : vector<128x128xf32>
    %cst_5 = arith.constant 0.000000e+00 : f32
    %6 = vector.broadcast %cst_5 : f32 to vector<128x128xf32>
    %7 = arith.maximumf %5, %6 : vector<128x128xf32>
    %c0_6 = arith.constant 0 : index
    %c0_7 = arith.constant 0 : index
    %8 = vector.load %arg4[%c0_6, %c0_7] : memref<128x256xf32, #tpu.memory_space<vmem>>, vector<128x128xf32>
    tpu.vector_store %arg4[%c0_6, %c0_7], %7 {strides = array<i32>} : memref<128x256xf32, #tpu.memory_space<vmem>>, vector<128x128xf32>,
    %c0_8 = arith.constant 0 : index
    %c128 = arith.constant 128 : index
    %9 = vector.load %arg4[%c0_8, %c128] : memref<128x256xf32, #tpu.memory_space<vmem>>, vector<128x128xf32>
    tpu.vector_store %arg4[%c0_8, %c128], %0 {strides = array<i32>} : memref<128x256xf32, #tpu.memory_space<vmem>>, vector<128x128xf32>,
    return
  }
  func.func @transform_0(%arg0: i32) -> (i32, i32) {
    %c0_i32 = arith.constant 0 : i32
    %c0_i32_0 = arith.constant 0 : i32
    return %arg0, %c0_i32 : i32, i32
  }
  func.func @transform_1(%arg0: i32) -> (i32, i32) {
    %c0_i32 = arith.constant 0 : i32
    %c0_i32_0 = arith.constant 0 : i32
    %c0_i32_1 = arith.constant 0 : i32
    return %c0_i32, %c0_i32_0 : i32, i32
  }
  func.func @transform_2(%arg0: i32) -> (i32, i32) {
    %c0_i32 = arith.constant 0 : i32
    %c0_i32_0 = arith.constant 0 : i32
    %c0_i32_1 = arith.constant 0 : i32
    return %c0_i32, %c0_i32_0 : i32, i32
  }
  func.func @transform_3(%arg0: i32) -> (i32, i32) {
    %c0_i32 = arith.constant 0 : i32
    %c0_i32_0 = arith.constant 0 : i32
    return %arg0, %c0_i32 : i32, i32
  }
}

</mosaic_0001>

<bundles_post_ra>
// kernel: tpu_custom_call.1
= control target key start
LH: loop header
LB: loop body
LE: loop exit
PB: predicated region body
PF: predicated region fallthrough
CT: control target
= control target key end

     0   :  { %8 = vsyncpa [#allocation3], 0  ;;  %s1199_s0 = inlined_call_operand.hbm [shape: f32[256,128], index: 0, kind: input, shape index: {}]   ;;  %s1200_s1 = inlined_call_operand.hbm [shape: f32[128,128], index: 1, kind: input, shape index: {}]   ;;  %s1201_s2 = inlined_call_operand.vmem [shape: f32[1,128], index: 2, kind: input, shape index: {}]   ;;  %s1202_s3 = inlined_call_operand.hbm [shape: f32[256,256], index: 3, kind: output, shape index: {}]  }
   0x1   :  { %10 = vsyncpa [#allocation3 + $0x1], 0 }
   0x2   :  { %11 = vsyncpa [#allocation6], 0 }
   0x3   :  { %12 = vsyncpa [#allocation4], 0 }
   0x4   :  { %14 = vsyncpa [#allocation4 + $0x1], 0  ;;  %s911_s12 = smov 0   ;;  %s913_s13 = smov 0  }
   0x5   :  { %s915_s14 = smov 0   ;;  %s917_s15 = smov 0  }
   0x6 LB: > { %s932_s16 = sadd.s32 4294967295, %s882_s15   ;;  %s536_s17 = sadd.s32 4294967294, %s882_s15   ;;  %s882_s15 = sphi %s917_s15, %s1222_s15   ;;  %s878_s14 = sphi %s915_s14, %s1221_s14   ;;  %s874_s13 = sphi %s913_s13, %s1220_s13   ;;  %s870_s12 = sphi %s911_s12, %s1219_s12  }
   0x7   : > { %p40_p0 = scmp.ne.s32.totalorder %s874_s13, %s870_s12  ;;  %p1203_p1 = scmp.eq.s32.totalorder %s932_s16, 0 }
   0x8   : > { %p112_p3 = scmp.eq.s32.totalorder %s536_s17, 1  ;;  %p537_p5 = scmp.ge.s32.totalorder %s882_s15, 1 }
   0x9   : > { %p941_p4 = por %p1203_p1, %p40_p0  ;;  %p119_p7 = scmp.lt.s32.totalorder %s882_s15, 3 }
   0xa   : > { %p946_p6 = por %p112_p3, %p40_p0  ;;  %s884_s21 = smov [#allocation5]  }
   0xb   : > { %s1206_s18 = scalar_select %p941_p4, 1, 0 }
   0xc   : > { %s1207_s19 = scalar_select %p946_p6, 1, 0 }
   0xd   : > { %p951_p8 = pnand %p537_p5, %p119_p7  ;;  %s131_s22 = sshll.u32 %s884_s21, 4  ;;  %s955_s22 = int_to_ptr.vmem [resolvable:$true] %s131_s22 }
   0xe   : > { %s967_s24 = sadd.s32 1, %s882_s15   ;;  %s27_s25 = sadd.s32 1, %s878_s14 }
   0xf   : > { %s1208_s20 = scalar_select %p951_p8, 1, 0 }
  0x10   : > { %p701_p9 = pneg %p951_p8  ;;  %s24_s26 = ssub.s32 %s882_s15, %s967_s24 }
  0x11   : > { %s754_s29 = scalar_lea.hbm %s1200_s1, 2048 }
  0x12   : > { %p962_p11 = pnand %p701_p9, %p1203_p1  ;;  %p755_p12 = scmp.ne.s32.totalorder %s1200_s1, %s754_s29 }
  0x13   : > { %p761_p5 = scmp.lt.u32.totalorder %s754_s29, %s1200_s1 }
  0x14   : > { %p756_p13 = pneg %p962_p11 }
  0x16   : > { %p757_p0 = pnand %p756_p13, %p755_p12 }
  0x18   : > { %p758_p3 = pneg %p757_p0 }
  0x1a   : > { %p763_p7 = pnand %p761_p5, %p758_p3 }
  0x1c   : > { %766 = shalt.err (!%p763_p7)
}
  0x1d   : > { %s767_s7 = scalar_lea.vmem %s955_s22, 2048  ;;  %p775_p2 = scmp.lt.s32.totalorder %s955_s22, %s955_s22 }
  0x1e   : > { %p768_p9 = scmp.ne.s32.totalorder %s955_s22, %s767_s7  ;;  %p776_p6 = scmp.lt.s32.totalorder %s767_s7, %s767_s7 }
  0x20   : > { %p770_p10 = pnand %p768_p9, %p756_p13  ;;  %p777_p4 = por %p776_p6, %p775_p2 }
  0x22   : > { %p771_p1 = pneg %p770_p10 }
  0x24   : > { %p778_p8 = pnand %p777_p4, %p771_p1 }
  0x26   : > { %781 = shalt.err (!%p778_p8)
}
  0x27   : > { %s885_s8 = smov 128   ;;  %s886_s9 = smov 8  }
  0x28   : > { %704 = dma.hbm_to_vmem [thread:$0]  (!%p962_p11), %s1200_s1, 2048, %s955_s22, [#allocation6], %s885_s8, %s885_s8, %s886_s9  }
  0x29   : > { %p25_p1 = scmp.eq.s32.totalorder %s24_s26, 0  ;;  %p34_p2 = scmp.ne.s32.totalorder %s878_s14, %s874_s13 }
  0x2a   : > { %p35_p4 = scmp.eq.s32.totalorder %s882_s15, 0  ;;  %p714_p6 = scmp.lt.s32.totalorder %s882_s15, 2 }
  0x2b   : > { %s1001_s17 = scalar_select %p25_p1, %s878_s14, %s27_s25  }
  0x2c   : > { %p36_p8 = por %p35_p4, %p34_p2  ;;  %p1210_p10 = scmp.eq.s32.totalorder %s932_s16, 1 }
  0x2d   : > { %s148_s23 = sand.u32 1, %s878_s14   ;;  %s554_s27 = sshll.u32 %s882_s15, 11 }
  0x2e   : > { %p1005_p12 = por %p1210_p10, %p34_p2  ;;  %s540_s28 = sshll.u32 %s148_s23, 7 }
  0x2f   : > { %s1014_s4 = scalar_lea.hbm %s1199_s0, %s554_s27  ;;  %s152_s22 = scalar_lea.vmem [#allocation2], %s540_s28 }
  0x30   : > { %s159_s25 = sshll.u32 %s152_s22, 4  ;;  %p1016_p11 = pnand %p714_p6, %p36_p8  ;;  %s1020_s25 = int_to_ptr.vmem [resolvable:$true] %s159_s25 }
  0x31   : > { %s1022_s5 = scalar_lea.sflag [#allocation3], %s148_s23  ;;  %s782_s6 = scalar_lea.hbm %s1014_s4, 2048 }
  0x32   : > { %p783_p13 = scmp.ne.s32.totalorder %s1014_s4, %s782_s6  ;;  %p784_p0 = pneg %p1016_p11 }
  0x33   : > { %s787_s11 = scalar_lea.hbm %s1199_s0, 4096  ;;  %p788_p7 = scmp.lt.u32.totalorder %s1014_s4, %s1199_s0 }
  0x34   : > { %p785_p3 = pnand %p784_p0, %p783_p13  ;;  %p789_p9 = scmp.lt.u32.totalorder %s787_s11, %s782_s6 }
  0x35   : > { %p791_p2 = scmp.lt.u32.totalorder %s782_s6, %s1014_s4 }
  0x36   : > { %p786_p5 = pneg %p785_p3  ;;  %p790_p1 = por %p789_p9, %p788_p7 }
  0x38   : > { %p792_p4 = por %p791_p2, %p790_p1 }
  0x3a   : > { %p793_p6 = pnand %p792_p4, %p786_p5 }
  0x3c   : > { %796 = shalt.err (!%p793_p6)
}
  0x3d   : > { %s797_s23 = scalar_lea.vmem %s1020_s25, 2048  ;;  %s887_s29 = smov [#allocation2]  }
  0x3e   : > { %p798_p8 = scmp.ne.s32.totalorder %s1020_s25, %s797_s23  ;;  %s802_s30 = sshll.u32 %s887_s29, 4  ;;  %s803_s30 = int_to_ptr.vmem [resolvable:$false] %s802_s30 }
  0x3f   : > { %s804_s22 = scalar_lea.vmem %s803_s30, 4096  ;;  %p805_p3 = scmp.lt.s32.totalorder %s1020_s25, %s803_s30 }
  0x40   : > { %p800_p10 = pnand %p798_p8, %p784_p0  ;;  %p806_p7 = scmp.lt.s32.totalorder %s804_s22, %s797_s23 }
  0x42   : > { %p801_p13 = pneg %p800_p10  ;;  %p807_p9 = por %p806_p7, %p805_p3 }
  0x44   : > { %p808_p1 = pnand %p807_p9, %p801_p13 }
  0x46   : > { %811 = shalt.err (!%p808_p1)
}
  0x47   : > { %708 = dma.hbm_to_vmem [thread:$0]  (!%p1016_p11), %s1014_s4, 2048, %s1020_s25, %s1022_s5, %s885_s8, %s885_s8, %s886_s9  }
  0x48   : > { %p1213_p0 = scmp.ne.s32.totalorder %s1208_s20, 0 }
  0x49   : > { %s1056_s6 = sand.u32 (!%p1213_p0), 1, %s874_s13   ;;  %p1214_p5 = scmp.ne.s32.totalorder (!%p1213_p0), %s1206_s18, 0 }
  0x4a   : > { %171 = sbr.rel (%p1213_p0) target bundleno = 364 (0x16c), region = 32  ;;  %s544_s7 = sshll.u32 (!%p1213_p0), %s1056_s6, 7 }
  0x4b   : > { %s174_s10 = scalar_lea.sflag (!%p1213_p0), [#allocation3], %s1056_s6  ;;  %s1060_s11 = scalar_lea.vmem (!%p1213_p0), [#allocation2], %s544_s7 }
  0x51   : > { %857 = dma.done.wait (%p1214_p5), %s174_s10, 2048  }
  0x52   : > { %859 = vsyncadd (%p1214_p5), %s174_s10, 4294965248  ;;  %p1215_p11 = scmp.eq.s32.totalorder %s932_s16, 0 }
  0x54   : > { %861 = dma.done.wait (%p1215_p11), [#allocation6], 2048   ;;  %p1216_p2 = pmov %p1215_p11 }
  0x55   : > { %v222_v0 = vld [vmem:[#allocation5] sm:$0xff]  ;;  %v223_v1 = vld [vmem:[#allocation5 + $0x8] sm:$0xff]  ;;  %v224_v2 = vld [vmem:[#allocation5 + $0x10] sm:$0xff]  ;;  %s546_s20 = sshll.u32 %s1056_s6, 8  ;;  %s556_s4 = sshll.u32 %s932_s16, 12 }
  0x56   : > { %863 = vsyncadd (%p1216_p2), [#allocation6], 4294965248  ;;  %v645_v3 = vpack.c.bf16 %v223_v1, %v222_v0  ;;  %v225_v4 = vld [vmem:[#allocation5 + $0x18] sm:$0xff]  ;;  %v226_v6 = vld [vmem:[#allocation5 + $0x20] sm:$0xff]  ;;  %s1073_s18 = scalar_lea.vmem [#allocation7], %s546_s20  ;;  %s1149_s5 = scalar_lea.hbm %s1202_s3, %s556_s4 }
  0x57   : > { %v649_v5 = vpack.c.bf16 %v225_v4, %v224_v2  ;;  %v227_v7 = vld [vmem:[#allocation5 + $0x28] sm:$0xff]  ;;  %v228_v8 = vld [vmem:[#allocation5 + $0x30] sm:$0xff]  ;;  %v229_v10 = vld [vmem:[#allocation5 + $0x38] sm:$0xff]  ;;  %s453_s25 = sshll.u32 %s1073_s18, 4  ;;  %s439_s27 = scalar_lea.sflag [#allocation4], %s1056_s6  ;;  %s1151_s25 = int_to_ptr.vmem [resolvable:$true] %s453_s25 }
  0x58   : > { %646 = vmatprep.subr.bf16.mxu0 %v645_v3  ;;  %677 = vmatprep.subr.bf16.mxu1 %v645_v3  ;;  %v653_v9 = vpack.c.bf16 %v227_v7, %v226_v6  ;;  %v206_v11 = vld [vmem:[%s1060_s11] sm:$0xff]  ;;  %v1078_v13 = vld [vmem:[%s1060_s11 + $0x8] sm:$0xff]  ;;  %v1084_v15 = vld [vmem:[%s1060_s11 + $0x10] sm:$0xff]  ;;  %v657_v23 = vpack.c.bf16 %v229_v10, %v228_v8  ;;  %s812_s28 = scalar_lea.vmem %s1151_s25, 4096  ;;  %s888_s23 = smov [#allocation7]  }
  0x59   : > { %648 = vmatpush3.bf16.msra.mxu0 %v645_v3  ;;  %685 = vmatpush3.bf16.msra.mxu1 %v645_v3  ;;  %v214_v12 = vld [vmem:[%s1060_s11 + $0x40] sm:$0xff]  ;;  %422 = vst [vmem:[%s1073_s18 + $0x8] sm:$0xff] %v206_v11  ;;  %v1081_v14 = vld [vmem:[%s1060_s11 + $0x48] sm:$0xff]  ;;  %423 = vst [vmem:[%s1073_s18 + $0x18] sm:$0xff] %v1078_v13  ;;  %p813_p4 = scmp.ne.s32.totalorder %s1151_s25, %s812_s28  ;;  %s816_s29 = sshll.u32 %s888_s23, 4  ;;  %s817_s29 = int_to_ptr.vmem [resolvable:$false] %s816_s29 }
  0x5a   : > { %650 = vmatprep.subr.bf16.mxu0 %v649_v5  ;;  %678 = vmatprep.subr.bf16.mxu1 %v649_v5  ;;  %430 = vst [vmem:[%s1073_s18 + $0x88] sm:$0xff] %v214_v12  ;;  %431 = vst [vmem:[%s1073_s18 + $0x98] sm:$0xff] %v1081_v14  ;;  %v1093_v16 = vld [vmem:[%s1060_s11 + $0x50] sm:$0xff]  ;;  %v1096_v17 = vld [vmem:[%s1060_s11 + $0x18] sm:$0xff]  ;;  %s818_s30 = scalar_lea.vmem %s817_s29, 8192  ;;  %p819_p10 = scmp.lt.s32.totalorder %s1151_s25, %s817_s29 }
  0x5b   : > { %621 = vmatprep.mubr.f32.mxu0 %v206_v11  ;;  %633 = vmatprep.mubr.f32.mxu1 %v214_v12  ;;  %424 = vst [vmem:[%s1073_s18 + $0x28] sm:$0xff] %v1084_v15  ;;  %v1099_v18 = vld [vmem:[%s1060_s11 + $0x58] sm:$0xff]  ;;  %v230_v19 = vld [vmem:[#allocation5 + $0x40] sm:$0xff]  ;;  %432 = vst [vmem:[%s1073_s18 + $0xa8] sm:$0xff] %v1093_v16  ;;  %p814_p6 = pnand %p813_p4, %p1005_p12  ;;  %p820_p13 = scmp.lt.s32.totalorder %s818_s30, %s812_s28 }
  0x5c   : > { %425 = vst [vmem:[%s1073_s18 + $0x38] sm:$0xff] %v1096_v17  ;;  %433 = vst [vmem:[%s1073_s18 + $0xb8] sm:$0xff] %v1099_v18  ;;  %v210_v20 = vld [vmem:[%s1060_s11 + $0x20] sm:$0xff]  ;;  %v211_v22 = vld [vmem:[%s1060_s11 + $0x28] sm:$0xff] }
  0x5d   : > { %652 = vmatpush3.bf16.msra.mxu0 %v649_v5  ;;  %686 = vmatpush3.bf16.msra.mxu1 %v649_v5  ;;  %v218_v21 = vld [vmem:[%s1060_s11 + $0x60] sm:$0xff]  ;;  %426 = vst [vmem:[%s1073_s18 + $0x48] sm:$0xff] %v210_v20  ;;  %427 = vst [vmem:[%s1073_s18 + $0x58] sm:$0xff] %v211_v22  ;;  %v219_v24 = vld [vmem:[%s1060_s11 + $0x68] sm:$0xff]  ;;  %p815_p8 = pneg %p814_p6  ;;  %p821_p3 = por %p820_p13, %p819_p10 }
  0x5e   : > { %654 = vmatprep.subr.bf16.mxu0 %v653_v9  ;;  %679 = vmatprep.subr.bf16.mxu1 %v653_v9  ;;  %434 = vst [vmem:[%s1073_s18 + $0xc8] sm:$0xff] %v218_v21  ;;  %v212_v25 = vld [vmem:[%s1060_s11 + $0x30] sm:$0xff]  ;;  %v231_v27 = vld [vmem:[#allocation5 + $0x48] sm:$0xff]  ;;  %435 = vst [vmem:[%s1073_s18 + $0xd8] sm:$0xff] %v219_v24 }
  0x5f   : > { %v220_v26 = vld [vmem:[%s1060_s11 + $0x70] sm:$0xff]  ;;  %428 = vst [vmem:[%s1073_s18 + $0x68] sm:$0xff] %v212_v25  ;;  %v213_v28 = vld [vmem:[%s1060_s11 + $0x38] sm:$0xff]  ;;  %v661_v30 = vpack.c.bf16 %v231_v27, %v230_v19  ;;  %v234_v34 = vld [vmem:[#allocation5 + $0x60] sm:$0xff]  ;;  %p822_p7 = pnand %p821_p3, %p815_p8 }
  0x60   : > { %436 = vst [vmem:[%s1073_s18 + $0xe8] sm:$0xff] %v220_v26  ;;  %v221_v29 = vld [vmem:[%s1060_s11 + $0x78] sm:$0xff]  ;;  %429 = vst [vmem:[%s1073_s18 + $0x78] sm:$0xff] %v213_v28  ;;  %v232_v31 = vld [vmem:[#allocation5 + $0x50] sm:$0xff] }
  0x61   : > { %437 = vst [vmem:[%s1073_s18 + $0xf8] sm:$0xff] %v221_v29  ;;  %656 = vmatpush3.bf16.msra.mxu0 %v653_v9  ;;  %687 = vmatpush3.bf16.msra.mxu1 %v653_v9  ;;  %v233_v32 = vld [vmem:[#allocation5 + $0x58] sm:$0xff]  ;;  %v235_v35 = vld [vmem:[#allocation5 + $0x68] sm:$0xff]  ;;  %v236_v37 = vld [vmem:[#allocation5 + $0x70] sm:$0xff] }
  0x62   : > { %658 = vmatprep.subr.bf16.mxu0 %v657_v23  ;;  %680 = vmatprep.subr.bf16.mxu1 %v657_v23  ;;  %v665_v33 = vpack.c.bf16 %v233_v32, %v232_v31  ;;  %v669_v36 = vpack.c.bf16 %v235_v35, %v234_v34  ;;  %v237_v38 = vld [vmem:[#allocation5 + $0x78] sm:$0xff]  ;;  %v547_v40 = vld [vmem:[%s1201_s2] ss:$0 sm:$0xff] }
  0x63   : > { %v673_v39 = vpack.c.bf16 %v237_v38, %v236_v37 }
  0x65   : > { %660 = vmatpush3.bf16.msra.mxu0 %v657_v23  ;;  %688 = vmatpush3.bf16.msra.mxu1 %v657_v23 }
  0x66   : > { %662 = vmatprep.subr.bf16.mxu0 %v661_v30  ;;  %681 = vmatprep.subr.bf16.mxu1 %v661_v30 }
  0x69   : > { %664 = vmatpush3.bf16.msra.mxu0 %v661_v30  ;;  %689 = vmatpush3.bf16.msra.mxu1 %v661_v30 }
  0x6a   : > { %666 = vmatprep.subr.bf16.mxu0 %v665_v33  ;;  %682 = vmatprep.subr.bf16.mxu1 %v665_v33 }
  0x6d   : > { %668 = vmatpush3.bf16.msra.mxu0 %v665_v33  ;;  %690 = vmatpush3.bf16.msra.mxu1 %v665_v33 }
  0x6e   : > { %670 = vmatprep.subr.bf16.mxu0 %v669_v36  ;;  %683 = vmatprep.subr.bf16.mxu1 %v669_v36 }
  0x71   : > { %672 = vmatpush3.bf16.msra.mxu0 %v669_v36  ;;  %691 = vmatpush3.bf16.msra.mxu1 %v669_v36 }
  0x72   : > { %674 = vmatprep.subr.bf16.mxu0 %v673_v39  ;;  %684 = vmatprep.subr.bf16.mxu1 %v673_v39 }
  0x75   : > { %676 = vmatpush3.bf16.msra.mxu0 %v673_v39  ;;  %692 = vmatpush3.bf16.msra.mxu1 %v673_v39 }
  0x78   : > { %622 = vmatmul.mubr.f32.vlgmr.msra.gmra.mrb[0].mxu0 %v1078_v13  ;;  %634 = vmatmul.mubr.f32.vlgmr.msra.gmra.mrb[0].mxu1 %v1081_v14 }
  0x79   : > { %624 = vmatprep.mubr.f32.mxu0 %v1084_v15  ;;  %636 = vmatprep.mubr.f32.mxu1 %v1093_v16 }
  0x7c   : > { %625 = vmatmul.mubr.f32.gmra.mrb[2].mxu0 %v1096_v17  ;;  %637 = vmatmul.mubr.f32.gmra.mrb[2].mxu1 %v1099_v18 }
  0x7d   : > { %627 = vmatprep.mubr.f32.mxu0 %v210_v20  ;;  %639 = vmatprep.mubr.f32.mxu1 %v218_v21 }
  0x80   : > { %628 = vmatmul.mubr.f32.gmra.mrb[4].mxu0 %v211_v22  ;;  %640 = vmatmul.mubr.f32.gmra.mrb[4].mxu1 %v219_v24 }
  0x81   : > { %630 = vmatprep.mubr.f32.mxu0 %v212_v25  ;;  %642 = vmatprep.mubr.f32.mxu1 %v220_v26 }
  0x84   : > { %631 = vmatmul.mubr.f32.gmra.mrb[6].mxu0 %v213_v28  ;;  %643 = vmatmul.mubr.f32.gmra.mrb[6].mxu1 %v221_v29 }
 0x14b   : > { %v623_v41 = vpop.f32.mrb[0].mxu0  ;;  %v635_v42 = vpop.f32.mrb[0].mxu1 }
 0x14c   : > { %v317_v43 = vadd.f32 %v623_v41, %v547_v40  ;;  %v357_v44 = vadd.f32 %v635_v42, %v547_v40  ;;  %v311_v45 = vpop.f32.mrb[1].mxu0  ;;  %v351_v46 = vpop.f32.mrb[1].mxu1 }
 0x14d   : > { %v312_v47 = vadd.f32 %v547_v40, %v311_v45  ;;  %v352_v48 = vadd.f32 %v547_v40, %v351_v46 }
 0x14e   : > { %v391_v49 = vmax.f32 %v317_v43, 0.0  ;;  %v399_v50 = vmax.f32 %v357_v44, 0.0 }
 0x14f   : > { %v390_v51 = vmax.f32 %v312_v47, 0.0  ;;  %v398_v52 = vmax.f32 %v352_v48, 0.0  ;;  %v626_v53 = vpop.f32.mrb[2].mxu0  ;;  %v638_v54 = vpop.f32.mrb[2].mxu1 }
 0x150   : > { %407 = vst [vmem:[%s1073_s18 + $0x10] sm:$0xff] %v391_v49  ;;  %415 = vst [vmem:[%s1073_s18 + $0x90] sm:$0xff] %v399_v50  ;;  %v327_v55 = vadd.f32 %v626_v53, %v547_v40  ;;  %v367_v56 = vadd.f32 %v638_v54, %v547_v40  ;;  %v321_v57 = vpop.f32.mrb[3].mxu0  ;;  %v361_v58 = vpop.f32.mrb[3].mxu1 }
 0x151   : > { %406 = vst [vmem:[%s1073_s18] sm:$0xff] %v390_v51  ;;  %414 = vst [vmem:[%s1073_s18 + $0x80] sm:$0xff] %v398_v52  ;;  %v322_v59 = vadd.f32 %v547_v40, %v321_v57  ;;  %v362_v60 = vadd.f32 %v547_v40, %v361_v58 }
 0x152   : > { %v393_v61 = vmax.f32 %v327_v55, 0.0  ;;  %v401_v62 = vmax.f32 %v367_v56, 0.0 }
 0x153   : > { %v392_v63 = vmax.f32 %v322_v59, 0.0  ;;  %v400_v0 = vmax.f32 %v362_v60, 0.0  ;;  %v629_v1 = vpop.f32.mrb[4].mxu0  ;;  %v641_v2 = vpop.f32.mrb[4].mxu1 }
 0x154   : > { %409 = vst [vmem:[%s1073_s18 + $0x30] sm:$0xff] %v393_v61  ;;  %417 = vst [vmem:[%s1073_s18 + $0xb0] sm:$0xff] %v401_v62  ;;  %v337_v3 = vadd.f32 %v629_v1, %v547_v40  ;;  %v377_v4 = vadd.f32 %v641_v2, %v547_v40  ;;  %v331_v5 = vpop.f32.mrb[5].mxu0  ;;  %v371_v6 = vpop.f32.mrb[5].mxu1 }
 0x155   : > { %408 = vst [vmem:[%s1073_s18 + $0x20] sm:$0xff] %v392_v63  ;;  %416 = vst [vmem:[%s1073_s18 + $0xa0] sm:$0xff] %v400_v0  ;;  %v332_v7 = vadd.f32 %v547_v40, %v331_v5  ;;  %v372_v8 = vadd.f32 %v547_v40, %v371_v6 }
 0x156   : > { %v395_v9 = vmax.f32 %v337_v3, 0.0  ;;  %v403_v10 = vmax.f32 %v377_v4, 0.0 }
 0x157   : > { %v394_v11 = vmax.f32 %v332_v7, 0.0  ;;  %v402_v12 = vmax.f32 %v372_v8, 0.0  ;;  %v632_v13 = vpop.f32.mrb[6].mxu0  ;;  %v644_v14 = vpop.f32.mrb[6].mxu1 }
 0x158   : > { %411 = vst [vmem:[%s1073_s18 + $0x50] sm:$0xff] %v395_v9  ;;  %419 = vst [vmem:[%s1073_s18 + $0xd0] sm:$0xff] %v403_v10  ;;  %v347_v15 = vadd.f32 %v632_v13, %v547_v40  ;;  %v387_v16 = vadd.f32 %v644_v14, %v547_v40  ;;  %v341_v17 = vpop.f32.mrb[7].mxu0  ;;  %v381_v18 = vpop.f32.mrb[7].mxu1 }
 0x159   : > { %410 = vst [vmem:[%s1073_s18 + $0x40] sm:$0xff] %v394_v11  ;;  %418 = vst [vmem:[%s1073_s18 + $0xc0] sm:$0xff] %v402_v12  ;;  %v342_v19 = vadd.f32 %v547_v40, %v341_v17  ;;  %v382_v20 = vadd.f32 %v547_v40, %v381_v18 }
 0x15a   : > { %v397_v21 = vmax.f32 %v347_v15, 0.0  ;;  %v405_v22 = vmax.f32 %v387_v16, 0.0 }
 0x15b   : > { %v396_v23 = vmax.f32 %v342_v19, 0.0  ;;  %v404_v24 = vmax.f32 %v382_v20, 0.0 }
 0x15c   : > { %413 = vst [vmem:[%s1073_s18 + $0x70] sm:$0xff] %v397_v21  ;;  %421 = vst [vmem:[%s1073_s18 + $0xf0] sm:$0xff] %v405_v22 }
 0x15d   : > { %412 = vst [vmem:[%s1073_s18 + $0x60] sm:$0xff] %v396_v23  ;;  %420 = vst [vmem:[%s1073_s18 + $0xe0] sm:$0xff] %v404_v24 }
 0x15e   : > { %825 = shalt.err (!%p822_p7)
}
 0x15f   : > { %s826_s22 = scalar_lea.hbm %s1149_s5, 4096  ;;  %s830_s11 = scalar_lea.hbm %s1202_s3, 8192 }
 0x160   : > { %p827_p9 = scmp.ne.s32.totalorder %s1149_s5, %s826_s22  ;;  %p831_p5 = scmp.lt.u32.totalorder %s1149_s5, %s1202_s3 }
 0x161   : > { %p832_p11 = scmp.lt.u32.totalorder %s830_s11, %s826_s22  ;;  %p834_p4 = scmp.lt.u32.totalorder %s826_s22, %s1149_s5 }
 0x162   : > { %p828_p1 = pnand %p827_p9, %p1005_p12 }
 0x163   : > { %p833_p2 = por %p832_p11, %p831_p5 }
 0x164   : > { %p829_p0 = pneg %p828_p1 }
 0x165   : > { %p835_p6 = por %p834_p4, %p833_p2 }
 0x167   : > { %p836_p8 = pnand %p835_p6, %p829_p0 }
 0x169   : > { %839 = shalt.err (!%p836_p8)
}
 0x16a   : > { %s889_s8 = smov 256   ;;  %s890_s9 = smov 16  }
 0x16b   : > { %699 = dma.vmem_to_hbm [thread:$0]  (%p1005_p12), %s1151_s25, 4096, %s1149_s5, %s439_s27, %s889_s8, %s889_s8, %s890_s9  }
 0x16c PF: > { %s468_s4 = sand.u32 1, %s870_s12   ;;  %p1217_p10 = scmp.ne.s32.totalorder %s1207_s19, 0 }
 0x16d   : > { %p1218_p13 = scmp.ge.s32.totalorder %s882_s15, 2  ;;  %s469_s16 = scalar_lea.sflag [#allocation4], %s468_s4 }
 0x16f   : > { %p710_p3 = pnand %p1218_p13, %p1217_p10 }
 0x171   : > { %865 = dma.done.wait (!%p710_p3), %s469_s16, 4096  }
 0x172   : > { %867 = vsyncadd (!%p710_p3), %s469_s16, 4294963200  ;;  %p17_p7 = scmp.ge.s32.totalorder %s967_s24, 4   ;;  %s1219_s12 = smov %s874_s13 }
 0x173   : > { %s1220_s13 = smov %s878_s14  ;;  %s1221_s14 = smov %s1001_s17 }
 0x174   : > { %s1222_s15 = smov %s967_s24  ;;  %19 = sbr.rel (!%p17_p7) target bundleno = 6 (0x6), region = 81 }
 0x17b   :  { %474 = vsyncpa [#allocation3], 1 }
 0x17c   :  { %476 = vsyncpa [#allocation3 + $0x1], 1 }
 0x17d   :  { %477 = vsyncpa [#allocation6], 1 }
 0x17e   :  { %478 = vsyncpa [#allocation4], 1 }
 0x17f   :  { %480 = vsyncpa [#allocation4 + $0x1], 1 }

</bundles_post_ra>
